<compile_context>
chip_gen: v7x
topology: tpu7x:2x2x1
jax: 0.10.0
libtpu: 0.0.40
codegen_flags: <defaults>
</compile_context>

<pallas_src>
import jax
import jax.numpy as jnp
from jax.experimental import pallas as pl
from jax.experimental.pallas import tpu as pltpu

NBCLASS = 8


def conv_pooling_kernel(x_ref, w1_ref, b1_ref, w2_ref, b2_ref, out_ref):
    # x_ref : (TILE_N, F, T)  -- original PyTorch layout, contiguous HBM slab
    # w1_ref: (F, H)   b1_ref: (1, H)
    # w2_ref: (H, C)   b2_ref: (1, C)
    # out_ref: (TILE_N, C)
    #
    # Max over frames in the input dtype (exact: comparison only); cast only
    # the small pooled result up. Avoids materializing an f32 copy of the
    # whole (TILE_N, F, T) tile.
    pooled = jnp.max(x_ref[...], axis=-1)                 # (TILE_N, F)

    # fc1 + ReLU (f32 accumulation on the MXU regardless of input dtype).
    h = jnp.dot(pooled, w1_ref[...], preferred_element_type=jnp.float32)
    h = jnp.maximum(h + b1_ref[...].astype(jnp.float32), 0.0)

    # fc2
    out = jnp.dot(h, w2_ref[...], preferred_element_type=jnp.float32)
    out = out + b2_ref[...].astype(jnp.float32)

    # (TILE_N, 8) store is lane-sparse (masked vst) but writeback bytes are
    # negligible vs. the x DMA traffic; not worth padding to 128 lanes.
    out_ref[...] = out.astype(out_ref.dtype)


def _round_up(v, m):
    return -(-v // m) * m


def _padded_block_bytes(shape, itemsize):
    """VMEM bytes of one buffered block: last two dims pad to (8, 128)."""
    shape = tuple(shape)
    if len(shape) < 2:
        shape = (1,) * (2 - len(shape)) + shape
    *lead, r, c = shape
    lead_n = 1
    for d in lead:
        lead_n *= d
    return lead_n * _round_up(r, 8) * _round_up(c, 128) * itemsize


def _choose_tile_n(n, f, t, x_itemsize, resident_block_bytes,
                   vmem_budget_bytes=28 << 20, max_tile=4096):
    """Pick the batch tile so ALL double-buffered VMEM blocks fit the budget.

    Counts: 2x the (lane/sublane-padded) x tile, 2x the (lane-padded f32)
    output block, and 2x the resident weight/bias blocks (conservatively
    assume they are double-buffered too). Budget is chosen to fit under the
    explicit vmem_limit_bytes on every generation (incl. v7x's 64 MiB VMEM).
    """
    per_row = 2 * (_round_up(f, 8) * _round_up(t, 128) * x_itemsize   # x tile
                   + 128 * 4)                                         # out row
    avail = max(vmem_budget_bytes - 2 * resident_block_bytes, per_row * 8)
    tile = max(8, min(max_tile, avail // per_row))
    tile = (tile // 8) * 8
    return n if n <= tile else tile


def conv_pooling(x, w1, b1, w2, b2, *, tile_n=None,
                 vmem_budget_bytes=28 << 20, vmem_limit_bytes=48 << 20):
    """x: (N, F, T) in the original PyTorch layout. Returns (N, NBCLASS) f32.

    No wrapper-side transpose/cast: the kernel streams contiguous
    (tile_n, F, T) slabs straight from HBM and reduces over frames in-kernel.
    If the producer can emit bf16 (halves the dominant HBM->VMEM DMA), pass
    bf16 directly; do NOT cast here (that would add a full extra HBM pass).
    """
    n, f, t = x.shape
    hidden = w1.shape[1]
    assert w1.shape == (f, hidden) and b1.shape == (1, hidden)
    assert w2.shape == (hidden, NBCLASS) and b2.shape == (1, NBCLASS)

    resident = sum(
        _padded_block_bytes(a.shape, jnp.dtype(a.dtype).itemsize)
        for a in (w1, b1, w2, b2))

    if tile_n is None:
        tile_n = _choose_tile_n(n, f, t, jnp.dtype(x.dtype).itemsize, resident,
                                vmem_budget_bytes=vmem_budget_bytes)
    grid = (pl.cdiv(n, tile_n),)
    # n % tile_n != 0: last block computes on padded rows, discarded by the
    # masked writeback. Harmless -- leave unmasked (compute has huge slack).

    return pl.pallas_call(
        conv_pooling_kernel,
        out_shape=jax.ShapeDtypeStruct((n, NBCLASS), jnp.float32),
        grid=grid,
        in_specs=[
            pl.BlockSpec((tile_n, f, t), lambda i: (i, 0, 0)),   # streamed x
            pl.BlockSpec((f, hidden), lambda i: (0, 0)),         # resident w1
            pl.BlockSpec((1, hidden), lambda i: (0, 0)),         # resident b1
            pl.BlockSpec((hidden, NBCLASS), lambda i: (0, 0)),   # resident w2
            pl.BlockSpec((1, NBCLASS), lambda i: (0, 0)),        # resident b2
        ],
        out_specs=pl.BlockSpec((tile_n, NBCLASS), lambda i: (i, 0)),
        compiler_params=pltpu.CompilerParams(
            # Batch rows are independent. Note: on v7x, verify in the profile
            # that both TensorCores run grid steps; if not, switch this axis
            # to pltpu.CORE_PARALLEL (or use pl.core_map).
            dimension_semantics=("parallel",),
            # Raise the scoped-VMEM default (16 MiB v5e / 32 MiB v6e, v7x) so
            # the tile budget above is honored; 48 MiB still fits v7x's
            # 64 MiB physical VMEM.
            vmem_limit_bytes=vmem_limit_bytes,
        ),
    )(x, w1, b1, w2, b2)


def init_params(key, input_feats):
    """Deterministic synthetic parameters (shapes match nn.Linear in __init__)."""
    hidden = input_feats // 4
    k1, k2, k3, k4 = jax.random.split(key, 4)
    # Stored as (in, out) -- i.e. the transpose of PyTorch's (out, in) weight.
    w1 = jax.random.uniform(k1, (input_feats, hidden), jnp.float32, -0.1, 0.1)
    b1 = jax.random.uniform(k2, (1, hidden), jnp.float32, -0.1, 0.1)
    w2 = jax.random.uniform(k3, (hidden, NBCLASS), jnp.float32, -0.1, 0.1)
    b2 = jax.random.uniform(k4, (1, NBCLASS), jnp.float32, -0.1, 0.1)
    return w1, b1, w2, b2


def reference(x, w1, b1, w2, b2):
    pooled = jnp.max(x, axis=-1)                       # (N, F)
    h = jnp.maximum(pooled @ w1 + b1, 0.0)
    return h @ w2 + b2


if __name__ == "__main__":
    key = jax.random.PRNGKey(0)
    kx, kp, kx2 = jax.random.split(key, 3)

    n_videos, n_feats, n_frames = 2, 32, 8   # (Nvideos, Nfeats, NFrames)
    x = jax.random.normal(kx, (n_videos, n_feats, n_frames), jnp.float32)
    w1, b1, w2, b2 = init_params(kp, n_feats)

    # 1) Small single-tile case (matches the module docstring shape), f32.
    out = jax.block_until_ready(conv_pooling(x, w1, b1, w2, b2))
    assert out.shape == (n_videos, NBCLASS), out.shape
    ref = reference(x, w1, b1, w2, b2)
    assert jnp.allclose(out, ref, atol=1e-5, rtol=1e-5), "mismatch vs reference (f32)"

    # 2) Multi-tile case with a partial trailing block: n=44, tile_n=16
    #    -> 3 grid steps, last block padded; weights stay resident.
    n2 = 44
    x2 = jax.random.normal(kx2, (n2, n_feats, n_frames), jnp.float32)
    out2 = jax.block_until_ready(conv_pooling(x2, w1, b1, w2, b2, tile_n=16))
    ref2 = reference(x2, w1, b1, w2, b2)
    assert out2.shape == (n2, NBCLASS), out2.shape
    assert jnp.allclose(out2, ref2, atol=1e-5, rtol=1e-5), "mismatch vs reference (tiled)"

    # 3) bf16 activations as if produced upstream in bf16 (half the HBM->VMEM
    #    DMA bytes); max runs in bf16 inside the kernel. Compare against a
    #    reference seeing the same bf16-rounded input.
    x2_bf = x2.astype(jnp.bfloat16)
    out_bf = jax.block_until_ready(conv_pooling(x2_bf, w1, b1, w2, b2, tile_n=16))
    ref_bf = reference(x2_bf.astype(jnp.float32), w1, b1, w2, b2)
    assert jnp.allclose(out_bf, ref_bf, atol=1e-2, rtol=1e-2), "mismatch vs reference (bf16)"

    print("KERNEL_OK")
</pallas_src>

<mosaic_0001>
module attributes {stable_mosaic.version = 11 : i64} {
  func.func @conv_pooling_kernel(%arg0: i32, %arg1: memref<2x32x8xf32, #tpu.memory_space<vmem>>, %arg2: memref<32x8xf32, #tpu.memory_space<vmem>>, %arg3: memref<1x8xf32, #tpu.memory_space<vmem>>, %arg4: memref<8x8xf32, #tpu.memory_space<vmem>>, %arg5: memref<1x8xf32, #tpu.memory_space<vmem>>, %arg6: memref<2x8xf32, #tpu.memory_space<vmem>>) attributes {dimension_semantics = [#tpu.dimension_semantics<parallel>], iteration_bounds = array<i64: 1>, scalar_prefetch = 0 : i64, scratch_operands = 0 : i64, tpu.core_type = #tpu.core_type<tc>, window_params = [{transform_indices = @transform_0, window_bounds = array<i64: 2, 32, 8>}, {pipeline_mode = #tpu.pipeline_mode<synchronous>, transform_indices = @transform_1, window_bounds = array<i64: 32, 8>}, {pipeline_mode = #tpu.pipeline_mode<synchronous>, transform_indices = @transform_2, window_bounds = array<i64: 1, 8>}, {pipeline_mode = #tpu.pipeline_mode<synchronous>, transform_indices = @transform_3, window_bounds = array<i64: 8, 8>}, {pipeline_mode = #tpu.pipeline_mode<synchronous>, transform_indices = @transform_4, window_bounds = array<i64: 1, 8>}, {transform_indices = @transform_5, window_bounds = array<i64: 2, 8>}]} {
    %c0 = arith.constant 0 : index
    %c0_0 = arith.constant 0 : index
    %c0_1 = arith.constant 0 : index
    %0 = vector.load %arg1[%c0, %c0_0, %c0_1] : memref<2x32x8xf32, #tpu.memory_space<vmem>>, vector<2x32x8xf32>
    %cst = arith.constant dense<0xFF800000> : vector<2x32xf32>
    %1 = vector.multi_reduction <maximumf>, %0, %cst [2] : vector<2x32x8xf32> to vector<2x32xf32>
    %c0_2 = arith.constant 0 : index
    %c0_3 = arith.constant 0 : index
    %2 = vector.load %arg2[%c0_2, %c0_3] : memref<32x8xf32, #tpu.memory_space<vmem>>, vector<32x8xf32>
    %cst_4 = arith.constant dense<0.000000e+00> : vector<2x8xf32>
    %3 = tpu.matmul %1, %2, %cst_4 {dimension_numbers = #tpu.dot_dimension_numbers<[1], [0], [0], [1], [0, 0, 1, 1], [], []>} : vector<2x32xf32>, vector<32x8xf32>, vector<2x8xf32> -> vector<2x8xf32>
    %c0_5 = arith.constant 0 : index
    %c0_6 = arith.constant 0 : index
    %4 = vector.load %arg3[%c0_5, %c0_6] : memref<1x8xf32, #tpu.memory_space<vmem>>, vector<1x8xf32>
    %5 = vector.broadcast %4 : vector<1x8xf32> to vector<2x8xf32>
    %6 = arith.addf %3, %5 : vector<2x8xf32>
    %cst_7 = arith.constant 0.000000e+00 : f32
    %7 = vector.broadcast %cst_7 : f32 to vector<2x8xf32>
    %8 = arith.maximumf %6, %7 : vector<2x8xf32>
    %c0_8 = arith.constant 0 : index
    %c0_9 = arith.constant 0 : index
    %9 = vector.load %arg4[%c0_8, %c0_9] : memref<8x8xf32, #tpu.memory_space<vmem>>, vector<8x8xf32>
    %cst_10 = arith.constant dense<0.000000e+00> : vector<2x8xf32>
    %10 = tpu.matmul %8, %9, %cst_10 {dimension_numbers = #tpu.dot_dimension_numbers<[1], [0], [0], [1], [0, 0, 1, 1], [], []>} : vector<2x8xf32>, vector<8x8xf32>, vector<2x8xf32> -> vector<2x8xf32>
    %c0_11 = arith.constant 0 : index
    %c0_12 = arith.constant 0 : index
    %11 = vector.load %arg5[%c0_11, %c0_12] : memref<1x8xf32, #tpu.memory_space<vmem>>, vector<1x8xf32>
    %12 = vector.broadcast %11 : vector<1x8xf32> to vector<2x8xf32>
    %13 = arith.addf %10, %12 : vector<2x8xf32>
    %c0_13 = arith.constant 0 : index
    %c0_14 = arith.constant 0 : index
    %14 = vector.load %arg6[%c0_13, %c0_14] : memref<2x8xf32, #tpu.memory_space<vmem>>, vector<2x8xf32>
    tpu.vector_store %arg6[%c0_13, %c0_14], %13 {strides = array<i32>} : memref<2x8xf32, #tpu.memory_space<vmem>>, vector<2x8xf32>,
    return
  }
  func.func @transform_0(%arg0: i32) -> (i32, i32, i32) {
    %c0_i32 = arith.constant 0 : i32
    %c0_i32_0 = arith.constant 0 : i32
    %c0_i32_1 = arith.constant 0 : i32
    return %arg0, %c0_i32, %c0_i32_0 : i32, i32, i32
  }
  func.func @transform_1(%arg0: i32) -> (i32, i32) {
    %c0_i32 = arith.constant 0 : i32
    %c0_i32_0 = arith.constant 0 : i32
    %c0_i32_1 = arith.constant 0 : i32
    return %c0_i32, %c0_i32_0 : i32, i32
  }
  func.func @transform_2(%arg0: i32) -> (i32, i32) {
    %c0_i32 = arith.constant 0 : i32
    %c0_i32_0 = arith.constant 0 : i32
    %c0_i32_1 = arith.constant 0 : i32
    return %c0_i32, %c0_i32_0 : i32, i32
  }
  func.func @transform_3(%arg0: i32) -> (i32, i32) {
    %c0_i32 = arith.constant 0 : i32
    %c0_i32_0 = arith.constant 0 : i32
    %c0_i32_1 = arith.constant 0 : i32
    return %c0_i32, %c0_i32_0 : i32, i32
  }
  func.func @transform_4(%arg0: i32) -> (i32, i32) {
    %c0_i32 = arith.constant 0 : i32
    %c0_i32_0 = arith.constant 0 : i32
    %c0_i32_1 = arith.constant 0 : i32
    return %c0_i32, %c0_i32_0 : i32, i32
  }
  func.func @transform_5(%arg0: i32) -> (i32, i32) {
    %c0_i32 = arith.constant 0 : i32
    %c0_i32_0 = arith.constant 0 : i32
    return %arg0, %c0_i32 : i32, i32
  }
}

</mosaic_0001>

<bundles_post_ra>
// kernel: tpu_custom_call.1
= control target key start
LH: loop header
LB: loop body
LE: loop exit
PB: predicated region body
PF: predicated region fallthrough
CT: control target
= control target key end

     0   :  { %vm29_vm0 = vcmask 64512   ;;  %s453_s0 = inlined_call_operand.vmem [shape: f32[2,32,8], index: 0, kind: input, shape index: {}]   ;;  %s454_s1 = inlined_call_operand.vmem [shape: f32[32,8], index: 1, kind: input, shape index: {}]   ;;  %s455_s2 = inlined_call_operand.vmem [shape: f32[1,8], index: 2, kind: input, shape index: {}]   ;;  %s456_s3 = inlined_call_operand.vmem [shape: f32[8,8], index: 3, kind: input, shape index: {}]   ;;  %s457_s4 = inlined_call_operand.vmem [shape: f32[1,8], index: 4, kind: input, shape index: {}]   ;;  %s458_s5 = inlined_call_operand.hbm [shape: f32[2,8], index: 5, kind: output, shape index: {}]  }
   0x1   :  { %v25_v0 = vld [vmem:[%s453_s0 + $0x20] sm:$0xff]  ;;  %v26_v2 = vld [vmem:[%s453_s0 + $0x28] sm:$0xff] }
   0x2   :  { %v21_v1 = vld [vmem:[%s453_s0] sm:$0xff]  ;;  %v42_v3 = vsel %vm29_vm0, %v25_v0, -inf  ;;  %v22_v5 = vld [vmem:[%s453_s0 + $0x8] sm:$0xff]  ;;  %v45_v6 = vsel %vm29_vm0, %v26_v2, -inf }
   0x3   :  { %v30_v4 = vsel %vm29_vm0, %v21_v1, -inf  ;;  %43 = vmax.xlane.f32.xlu1 %v42_v3  ;;  %v33_v7 = vsel %vm29_vm0, %v22_v5, -inf }
   0x4   :  { %31 = vmax.xlane.f32.xlu0 %v30_v4 }
   0x5   :  { %10 = vsyncpa [#allocation3], 0  ;;  %v27_v8 = vld [vmem:[%s453_s0 + $0x30] sm:$0xff]  ;;  %v28_v12 = vld [vmem:[%s453_s0 + $0x38] sm:$0xff]  ;;  %v353_v19 = vmov 0.0|0.0   ;;  %vm354_vm1 = vmmov 0   ;;  %v73_v24 = vlaneseq }
   0x6   :  { %v23_v9 = vld [vmem:[%s453_s0 + $0x10] sm:$0xff]  ;;  %v48_v10 = vsel %vm29_vm0, %v27_v8, -inf  ;;  %v24_v13 = vld [vmem:[%s453_s0 + $0x18] sm:$0xff]  ;;  %v51_v14 = vsel %vm29_vm0, %v28_v12, -inf  ;;  %v54_v16 = vld [vmem:[%s454_s1] sm:$0xff]  ;;  %319 = vmatprep.subr.bf16.mxu0 %v353_v19  ;;  %v355_v23 = vmov 0.0  }
   0x7   :  { %46 = vmax.xlane.f32.xlu1 %v45_v6  ;;  %v36_v11 = vsel %vm29_vm0, %v23_v9, -inf  ;;  %v39_v15 = vsel %vm29_vm0, %v24_v13, -inf  ;;  %v55_v17 = vld [vmem:[%s454_s1 + $0x8] sm:$0xff]  ;;  %v56_v20 = vld [vmem:[%s454_s1 + $0x10] sm:$0xff]  ;;  %v57_v21 = vld [vmem:[%s454_s1 + $0x18] sm:$0xff]  ;;  %311 = vmatprep.mubr.msk.f32.mxu0 %vm354_vm1, %v355_v23  ;;  %v74_v25 = vand.u32 127, %v73_v24 }
   0x8   :  { %34 = vmax.xlane.f32.xlu0 %v33_v7  ;;  %v320_v18 = vpack.c.bf16 %v55_v17, %v54_v16  ;;  %v323_v22 = vpack.c.bf16 %v57_v21, %v56_v20  ;;  %314 = vmatprep.subr.mxu1 %v355_v23  ;;  %v76_v30 = vshrl.u32 %v73_v24, 7  ;;  %vm84_vm2 = vcmask 130112   ;;  %v195_v57 = vld [vmem:[%s456_s3] sm:$0xff]  ;;  %s356_s21 = smov [#allocation2]  }
   0x9   :  { %316 = vmatprep.mubr.msk.f32.mxu1 %vm354_vm1, %v355_v23  ;;  %v79_v28 = vadd.s32 4294967288, %v74_v25  ;;  %v86_v29 = vadd.s32 4294967280, %v74_v25  ;;  %v93_v34 = vadd.s32 4294967272, %v74_v25  ;;  %vm91_vm3 = vcmask 195712   ;;  %315 = vmatpush3.msra.mxu1 %v195_v57  ;;  %v292_v58 = vld [vmem:[%s455_s2] ss:$0 sm:$0xff] }
   0xa   :  { %321 = vmatpush3.bf16.msra.mxu0 %v320_v18  ;;  %v77_v36 = vsub.s32 %v74_v25, %v76_v30  ;;  %vm98_vm4 = vcmask 261312   ;;  %vm119_vm5 = vcmask 1041409   ;;  %vm121_vm6 = vcmask 261120   ;;  %v294_v63 = vld [vmem:[%s457_s4] ss:$0 sm:$0xff]  ;;  %s284_s22 = sshll.u32 %s356_s21, 4  ;;  %s285_s22 = int_to_ptr.vmem [resolvable:$true] %s284_s22 }
   0xb   :  { %49 = vmax.xlane.f32.xlu1 %v48_v10  ;;  %322 = vmatprep.subr.bf16.mxu0 %v353_v19  ;;  %v82_v33 = vsub.s32 %v79_v28, %v76_v30  ;;  %v89_v35 = vsub.s32 %v86_v29, %v76_v30  ;;  %v96_v41 = vsub.s32 %v93_v34, %v76_v30  ;;  %vm276_vm7 = vcmask 58368   ;;  %s329_s3 = scalar_lea.vmem %s285_s22, 32  ;;  %p334_p1 = scmp.lt.s32.totalorder %s285_s22, %s285_s22 }
   0xc   :  { %37 = vmax.xlane.f32.xlu0 %v36_v11  ;;  %p330_p0 = scmp.ne.s32.totalorder %s285_s22, %s329_s3  ;;  %p335_p2 = scmp.lt.s32.totalorder %s329_s3, %s329_s3 }
   0xe   :  { %324 = vmatpush3.bf16.msra.mxu0 %v323_v22  ;;  %p336_p3 = por %p335_p2, %p334_p1 }
   0xf   :  { %52 = vmax.xlane.f32.xlu1 %v51_v14 }
  0x10   :  { %40 = vmax.xlane.f32.xlu0 %v39_v15  ;;  %p337_p4 = pnand %p336_p3, %p330_p0 }
  0x90   :  { %v44_v26 = vpop.xlane.xlu1 %43 }
  0x91   :  { %v32_v27 = vpop.xlane.xlu0 %31  ;;  %v103_v44 = vrot.slane %v44_v26, %v77_v36 }
  0x92   :  { %v78_v45 = vrot.slane %v32_v27, %v77_v36 }
  0x94   :  { %v47_v31 = vpop.xlane.xlu1 %46 }
  0x95   :  { %v35_v32 = vpop.xlane.xlu0 %34  ;;  %v107_v39 = vrot.slane %v47_v31, %v82_v33 }
  0x96   :  { %v83_v40 = vrot.slane %v35_v32, %v82_v33 }
  0x97   :  { %v108_v48 = vsel %vm84_vm2, %v107_v39, %v103_v44 }
  0x98   :  { %v50_v37 = vpop.xlane.xlu1 %49  ;;  %v85_v49 = vsel %vm84_vm2, %v83_v40, %v78_v45 }
  0x99   :  { %v38_v38 = vpop.xlane.xlu0 %37  ;;  %v112_v42 = vrot.slane %v50_v37, %v89_v35 }
  0x9a   :  { %v90_v43 = vrot.slane %v38_v38, %v89_v35 }
  0x9b   :  { %v113_v52 = vsel %vm91_vm3, %v112_v42, %v108_v48 }
  0x9c   :  { %v53_v46 = vpop.xlane.xlu1 %52  ;;  %v92_v53 = vsel %vm91_vm3, %v90_v43, %v85_v49 }
  0x9d   :  { %v41_v47 = vpop.xlane.xlu0 %40  ;;  %v117_v50 = vrot.slane %v53_v46, %v96_v41 }
  0x9e   :  { %v97_v51 = vrot.slane %v41_v47, %v96_v41 }
  0x9f   :  { %v118_v54 = vsel %vm98_vm4, %v117_v50, %v113_v52 }
  0xa0   :  { %v99_v55 = vsel %vm98_vm4, %v97_v51, %v92_v53 }
  0xa1   :  { %v120_v56 = vsel %vm119_vm5, %v118_v54, %v99_v55 }
  0xa2   :  { %312 = vmatmul.mubr.msk.f32.vlgmr.msra.gmra.mrb[0].mxu0 %vm121_vm6, %v120_v56 }
 0x175   :  { %v190_v59 = vpop.f32.mrb[0].mxu0 }
 0x176   :  { %v191_v60 = vadd.f32 %v292_v58, %v190_v59  ;;  %v313_v61 = vpop.f32.mrb[1].mxu0 }
 0x178   :  { %v194_v62 = vmax.f32 %v191_v60, 0.0 }
 0x17a   :  { %317 = vmatmul.mubr.msk.f32.vlgmr.msra.gmra.mrb[0].mxu1 %vm29_vm0, %v194_v62 }
 0x24d   :  { %v272_v0 = vpop.f32.mrb[0].mxu1 }
 0x24e   :  { %v273_v1 = vadd.f32 %v294_v63, %v272_v0  ;;  %v318_v2 = vpop.f32.mrb[1].mxu1 }
 0x250   :  { %277 = vst.msk [vmem:[#allocation2] sm:$0x3] %vm276_vm7, %v273_v1 }
 0x251   :  { %340 = shalt.err (!%p337_p4)
}
 0x252   :  { %s341_s24 = scalar_lea.hbm %s458_s5, 32 }
 0x253   :  { %p342_p5 = scmp.ne.s32.totalorder %s458_s5, %s341_s24  ;;  %p345_p6 = scmp.lt.u32.totalorder %s341_s24, %s458_s5 }
 0x255   :  { %p347_p7 = pnand %p345_p6, %p342_p5 }
 0x257   :  { %350 = shalt.err (!%p347_p7)
}
 0x258   :  { %287 = dma.vmem_to_hbm [thread:$0]  %s285_s22, 32, %s458_s5, [#allocation3]  }
 0x259   :  { %351 = dma.done.wait [#allocation3], 32  }
 0x25a   :  { %352 = vsyncadd [#allocation3], 4294967264 }
 0x25b   :  { %291 = vsyncpa [#allocation3], 1 }

</bundles_post_ra>
